<compile_context>
chip_gen: v6e
topology: v6e:2x2x1
jax: 0.10.0
libtpu: 0.0.40
codegen_flags: <defaults>
</compile_context>

<pallas_src>
import functools

import jax
import jax.numpy as jnp
from jax.experimental import pallas as pl
from jax.experimental.pallas import tpu as pltpu

_NEG_BIG = -1e30


def _round_up(x, m):
    return ((x + m - 1) // m) * m


def _vmem_capacity_bytes():
    try:
        return int(pltpu.get_tpu_info().vmem_capacity_bytes)
    except Exception:
        return 64 * 2**20  # conservative fallback: v7x per-core VMEM


def _resident_kernel(x_ref, w_ref, b_ref, o_ref):
    # x_ref: (TB, D)  w_ref: (D, C_pad)  b_ref: (1, C_pad)  o_ref: (TB, C_pad)
    logits = jnp.dot(x_ref[...], w_ref[...], preferred_element_type=jnp.float32)
    logits = logits + b_ref[...].astype(jnp.float32)
    # Padded class lanes carry a -1e30 bias: they never win the max and their
    # exp underflows to 0, so no explicit mask is needed.
    m = jnp.max(logits, axis=-1, keepdims=True)
    shifted = logits - m
    lse = jnp.log(jnp.sum(jnp.exp(shifted), axis=-1, keepdims=True))
    o_ref[...] = (shifted - lse).astype(o_ref.dtype)


def _class_tiled_kernel(x_ref, w_ref, b_ref, o_ref, *, class_tile):
    # grid = (batch_tiles, class_tiles). o_ref is the full (TB, C_pad) f32 row
    # block, resident across the class axis, and doubles as the logits scratch.
    j = pl.program_id(1)
    logits = jnp.dot(x_ref[...], w_ref[...], preferred_element_type=jnp.float32)
    logits = logits + b_ref[...].astype(jnp.float32)
    col = pl.multiple_of(j * class_tile, 128)
    o_ref[:, pl.ds(col, class_tile)] = logits.astype(o_ref.dtype)

    @pl.when(j == pl.num_programs(1) - 1)
    def _finalize():
        full = o_ref[...].astype(jnp.float32)
        m = jnp.max(full, axis=-1, keepdims=True)
        shifted = full - m
        lse = jnp.log(jnp.sum(jnp.exp(shifted), axis=-1, keepdims=True))
        o_ref[...] = (shifted - lse).astype(o_ref.dtype)


def linear_logsoftmax(x, weight, bias, *, batch_tile=256, class_tile=None,
                      force_class_tiling=False):
    """log_softmax(x @ weight.T + bias, axis=1).

    x: (B, D); weight: (C, D) (torch nn.Linear layout); bias: (C,).
    Returns f32 (B, C) log-probabilities.
    """
    B, D = x.shape
    C = weight.shape[0]
    out_dtype = jnp.float32  # keep log-probs in f32 even for bf16 activations
    w_bytes = weight.dtype.itemsize

    vmem_cap = _vmem_capacity_bytes()

    # ---- choose path: keep the weight VMEM-resident iff it comfortably fits --
    resident_bytes = _round_up(C, 128) * D * w_bytes  # single-buffered weight
    use_class_tiling = force_class_tiling or resident_bytes > vmem_cap // 3

    if use_class_tiling:
        if class_tile is not None:
            TC = _round_up(class_tile, 128)
        else:
            # keep the double-buffered (D, TC) weight tile under ~8 MiB
            TC = ((8 * 2**20) // max(1, 2 * D * w_bytes)) // 128 * 128
            TC = max(128, min(TC, 1024))
        TC = min(TC, _round_up(C, 128))
        C_pad = _round_up(C, TC)
    else:
        TC = None
        C_pad = _round_up(C, 128)

    # ---- batch tiling: load-balanced, >=2 tiles when possible (v7x has 2 TCs)
    if C_pad >= 2048:
        batch_tile = min(batch_tile, 128)  # cap the live f32 logits per tile
    want_tiles = max(pl.cdiv(B, batch_tile), 2 if B > 8 else 1)
    TB = _round_up(pl.cdiv(B, want_tiles), 8)
    if use_class_tiling:
        # the resident (TB, C_pad) f32 output block must fit ~half of VMEM
        tb_cap = max(8, ((vmem_cap // 2) // (8 * C_pad)) // 8 * 8)
        TB = max(8, min(TB, tb_cap))
    n_bt = pl.cdiv(B, TB)

    # ---- one-time parameter layout (transpose + class padding) ---------------
    # TODO(synk): in a real deployment do this once at parameter-init time.
    w_t = weight.T
    if C_pad != C:
        w_t = jnp.pad(w_t, ((0, 0), (0, C_pad - C)))
        b_p = jnp.pad(bias, (0, C_pad - C), constant_values=_NEG_BIG)
    else:
        b_p = bias
    b_p = b_p.reshape(1, C_pad)

    cost = pl.CostEstimate(
        flops=int(2 * B * D * C_pad),
        transcendentals=int(2 * B * C_pad),
        bytes_accessed=int(B * D * x.dtype.itemsize
                           + C_pad * D * w_bytes * (n_bt if use_class_tiling else 1)
                           + C_pad * b_p.dtype.itemsize
                           + B * C * 4),
    )

    if not use_class_tiling:
        est = (2 * TB * D * x.dtype.itemsize          # x, double-buffered
               + C_pad * D * w_bytes                   # weight, single-buffered
               + C_pad * b_p.dtype.itemsize            # bias, single-buffered
               + 2 * TB * C_pad * 4)                   # out, double-buffered
        vmem_limit = int(min(max(2 * est, 32 * 2**20), vmem_cap - 8 * 2**20))

        def call(single_buffer_consts):
            const_kw = (dict(pipeline_mode=pl.Buffered(1))
                        if single_buffer_consts else {})
            return pl.pallas_call(
                _resident_kernel,
                out_shape=jax.ShapeDtypeStruct((B, C), out_dtype),
                grid_spec=pltpu.PrefetchScalarGridSpec(
                    num_scalar_prefetch=0,
                    grid=(n_bt,),
                    in_specs=[
                        pl.BlockSpec((TB, D), lambda i: (i, 0)),
                        pl.BlockSpec((D, C_pad), lambda i: (0, 0), **const_kw),
                        pl.BlockSpec((1, C_pad), lambda i: (0, 0), **const_kw),
                    ],
                    out_specs=pl.BlockSpec((TB, C_pad), lambda i: (i, 0)),
                ),
                compiler_params=pltpu.CompilerParams(
                    dimension_semantics=("parallel",),
                    vmem_limit_bytes=vmem_limit,
                ),
                cost_estimate=cost,
            )(x, w_t, b_p)

        try:
            # Constant-index weight/bias blocks: single-buffer them so the big
            # weight allocation is not doubled (key on v7x's 64 MiB VMEM).
            return call(True)
        except Exception:
            # pl.Buffered(1) unsupported on this jax build -> default buffering.
            return call(False)

    # ---- class-tiled path for large heads ------------------------------------
    n_ct = C_pad // TC
    est = (2 * TB * D * x.dtype.itemsize
           + 2 * D * TC * w_bytes
           + 2 * TC * b_p.dtype.itemsize
           + 2 * TB * C_pad * 4)
    vmem_limit = int(min(max(2 * est, 32 * 2**20), vmem_cap - 8 * 2**20))

    kernel = functools.partial(_class_tiled_kernel, class_tile=TC)
    # TODO(synk): for heads where even an (8, C_pad) f32 row block is too big,
    # switch to a fully streamed two-pass (online-LSE then rewrite) kernel.
    return pl.pallas_call(
        kernel,
        out_shape=jax.ShapeDtypeStruct((B, C), out_dtype),
        grid_spec=pltpu.PrefetchScalarGridSpec(
            num_scalar_prefetch=0,
            grid=(n_bt, n_ct),
            in_specs=[
                pl.BlockSpec((TB, D), lambda i, j: (i, 0)),   # resident per batch tile
                pl.BlockSpec((D, TC), lambda i, j: (0, j)),   # streamed class tiles
                pl.BlockSpec((1, TC), lambda i, j: (0, j)),
            ],
            out_specs=pl.BlockSpec((TB, C_pad), lambda i, j: (i, 0)),
        ),
        compiler_params=pltpu.CompilerParams(
            dimension_semantics=("parallel", "arbitrary"),
            vmem_limit_bytes=vmem_limit,
        ),
        cost_estimate=cost,
    )(x, w_t, b_p)


if __name__ == "__main__":
    key = jax.random.PRNGKey(0)

    # Small shapes consistent with the module: batch=8, input_dim=32, nclass=16.
    B, D, C = 8, 32, 16
    kx, kw, kb = jax.random.split(key, 3)
    x = jax.random.normal(kx, (B, D), dtype=jnp.float32)
    bound = 1.0 / jnp.sqrt(jnp.float32(D))   # nn.Linear default init range
    weight = jax.random.uniform(kw, (C, D), minval=-bound, maxval=bound,
                                dtype=jnp.float32)
    bias = jax.random.uniform(kb, (C,), minval=-bound, maxval=bound,
                              dtype=jnp.float32)

    ref = jax.nn.log_softmax(x @ weight.T + bias, axis=1)
    out = jax.block_until_ready(linear_logsoftmax(x, weight, bias))
    assert out.shape == (B, C) and out.dtype == jnp.float32
    assert jnp.allclose(out, ref, atol=1e-5, rtol=1e-5), "resident path mismatch"

    # Also exercise the large-head (class-tiled) path at small scale: uneven
    # batch (edge rows) and nclass not a multiple of the class tile.
    B2, C2 = 20, 200
    kx2, kw2, kb2 = jax.random.split(jax.random.PRNGKey(0), 3)
    x2 = jax.random.normal(kx2, (B2, D), dtype=jnp.float32)
    w2 = jax.random.uniform(kw2, (C2, D), minval=-bound, maxval=bound,
                            dtype=jnp.float32)
    b2 = jax.random.uniform(kb2, (C2,), minval=-bound, maxval=bound,
                            dtype=jnp.float32)
    ref2 = jax.nn.log_softmax(x2 @ w2.T + b2, axis=1)
    out2 = jax.block_until_ready(
        linear_logsoftmax(x2, w2, b2, force_class_tiling=True, class_tile=128))
    assert out2.shape == (B2, C2), "class-tiled path wrong shape"
    assert jnp.allclose(out2, ref2, atol=1e-5, rtol=1e-5), "class-tiled path mismatch"

    print("KERNEL_OK")
</pallas_src>

<mosaic_0001>
module attributes {stable_mosaic.version = 11 : i64} {
  func.func @_resident_kernel(%arg0: i32, %arg1: memref<8x32xf32, #tpu.memory_space<vmem>>, %arg2: memref<32x128xf32, #tpu.memory_space<vmem>>, %arg3: memref<1x128xf32, #tpu.memory_space<vmem>>, %arg4: memref<8x128xf32, #tpu.memory_space<vmem>>) attributes {dimension_semantics = [#tpu.dimension_semantics<parallel>], iteration_bounds = array<i64: 1>, scalar_prefetch = 0 : i64, scratch_operands = 0 : i64, tpu.core_type = #tpu.core_type<tc>, window_params = [{transform_indices = @transform_0, window_bounds = array<i64: 8, 32>}, {pipeline_mode = #tpu.pipeline_mode<synchronous>, transform_indices = @transform_1, window_bounds = array<i64: 32, 128>}, {pipeline_mode = #tpu.pipeline_mode<synchronous>, transform_indices = @transform_2, window_bounds = array<i64: 1, 128>}, {transform_indices = @transform_3, window_bounds = array<i64: 8, 128>}]} {
    %c0 = arith.constant 0 : index
    %c0_0 = arith.constant 0 : index
    %0 = vector.load %arg1[%c0, %c0_0] : memref<8x32xf32, #tpu.memory_space<vmem>>, vector<8x32xf32>
    %c0_1 = arith.constant 0 : index
    %c0_2 = arith.constant 0 : index
    %1 = vector.load %arg2[%c0_1, %c0_2] : memref<32x128xf32, #tpu.memory_space<vmem>>, vector<32x128xf32>
    %cst = arith.constant dense<0.000000e+00> : vector<8x128xf32>
    %2 = tpu.matmul %0, %1, %cst {dimension_numbers = #tpu.dot_dimension_numbers<[1], [0], [0], [1], [0, 0, 1, 1], [], []>} : vector<8x32xf32>, vector<32x128xf32>, vector<8x128xf32> -> vector<8x128xf32>
    %c0_3 = arith.constant 0 : index
    %c0_4 = arith.constant 0 : index
    %3 = vector.load %arg3[%c0_3, %c0_4] : memref<1x128xf32, #tpu.memory_space<vmem>>, vector<1x128xf32>
    %4 = vector.broadcast %3 : vector<1x128xf32> to vector<8x128xf32>
    %5 = arith.addf %2, %4 : vector<8x128xf32>
    %cst_5 = arith.constant dense<0xFF800000> : vector<8xf32>
    %6 = vector.multi_reduction <maximumf>, %5, %cst_5 [1] : vector<8x128xf32> to vector<8xf32>
    %7 = vector.shape_cast %6 : vector<8xf32> to vector<8x1xf32>
    %8 = vector.broadcast %7 : vector<8x1xf32> to vector<8x128xf32>
    %9 = arith.subf %5, %8 : vector<8x128xf32>
    %10 = math.exp %9 : vector<8x128xf32>
    %cst_6 = arith.constant dense<0.000000e+00> : vector<8xf32>
    %11 = vector.multi_reduction <add>, %10, %cst_6 [1] : vector<8x128xf32> to vector<8xf32>
    %12 = vector.shape_cast %11 : vector<8xf32> to vector<8x1xf32>
    %13 = math.log %12 : vector<8x1xf32>
    %14 = vector.broadcast %13 : vector<8x1xf32> to vector<8x128xf32>
    %15 = arith.subf %9, %14 : vector<8x128xf32>
    %c0_7 = arith.constant 0 : index
    %c0_8 = arith.constant 0 : index
    %16 = vector.load %arg4[%c0_7, %c0_8] : memref<8x128xf32, #tpu.memory_space<vmem>>, vector<8x128xf32>
    tpu.vector_store %arg4[%c0_7, %c0_8], %15 {strides = array<i32>} : memref<8x128xf32, #tpu.memory_space<vmem>>, vector<8x128xf32>,
    return
  }
  func.func @transform_0(%arg0: i32) -> (i32, i32) {
    %c0_i32 = arith.constant 0 : i32
    %c0_i32_0 = arith.constant 0 : i32
    return %arg0, %c0_i32 : i32, i32
  }
  func.func @transform_1(%arg0: i32) -> (i32, i32) {
    %c0_i32 = arith.constant 0 : i32
    %c0_i32_0 = arith.constant 0 : i32
    %c0_i32_1 = arith.constant 0 : i32
    return %c0_i32, %c0_i32_0 : i32, i32
  }
  func.func @transform_2(%arg0: i32) -> (i32, i32) {
    %c0_i32 = arith.constant 0 : i32
    %c0_i32_0 = arith.constant 0 : i32
    %c0_i32_1 = arith.constant 0 : i32
    return %c0_i32, %c0_i32_0 : i32, i32
  }
  func.func @transform_3(%arg0: i32) -> (i32, i32) {
    %c0_i32 = arith.constant 0 : i32
    %c0_i32_0 = arith.constant 0 : i32
    return %arg0, %c0_i32 : i32, i32
  }
}

module attributes {stable_mosaic.version = 11 : i64} {
  func.func @_resident_kernel(%arg0: i32, %arg1: memref<8x32xf32, #tpu.memory_space<vmem>>, %arg2: memref<32x128xf32, #tpu.memory_space<vmem>>, %arg3: memref<1x128xf32, #tpu.memory_space<vmem>>, %arg4: memref<8x128xf32, #tpu.memory_space<vmem>>) attributes {dimension_semantics = [#tpu.dimension_semantics<parallel>], iteration_bounds = array<i64: 1>, scalar_prefetch = 0 : i64, scratch_operands = 0 : i64, tpu.core_type = #tpu.core_type<tc>, window_params = [{transform_indices = @transform_0, window_bounds = array<i64: 8, 32>}, {pipeline_mode = #tpu.pipeline_mode<synchronous>, transform_indices = @transform_1, window_bounds = array<i64: 32, 128>}, {pipeline_mode = #tpu.pipeline_mode<synchronous>, transform_indices = @transform_2, window_bounds = array<i64: 1, 128>}, {transform_indices = @transform_3, window_bounds = array<i64: 8, 128>}]} {
    %c0 = arith.constant 0 : index
    %c0_0 = arith.constant 0 : index
    %0 = vector.load %arg1[%c0, %c0_0] : memref<8x32xf32, #tpu.memory_space<vmem>>, vector<8x32xf32>
    %c0_1 = arith.constant 0 : index
    %c0_2 = arith.constant 0 : index
    %1 = vector.load %arg2[%c0_1, %c0_2] : memref<32x128xf32, #tpu.memory_space<vmem>>, vector<32x128xf32>
    %cst = arith.constant dense<0.000000e+00> : vector<8x128xf32>
    %2 = tpu.matmul %0, %1, %cst {dimension_numbers = #tpu.dot_dimension_numbers<[1], [0], [0], [1], [0, 0, 1, 1], [], []>} : vector<8x32xf32>, vector<32x128xf32>, vector<8x128xf32> -> vector<8x128xf32>
    %c0_3 = arith.constant 0 : index
    %c0_4 = arith.constant 0 : index
    %3 = vector.load %arg3[%c0_3, %c0_4] : memref<1x128xf32, #tpu.memory_space<vmem>>, vector<1x128xf32>
    %4 = vector.broadcast %3 : vector<1x128xf32> to vector<8x128xf32>
    %5 = arith.addf %2, %4 : vector<8x128xf32>
    %cst_5 = arith.constant dense<0xFF800000> : vector<8xf32>
    %6 = vector.multi_reduction <maximumf>, %5, %cst_5 [1] : vector<8x128xf32> to vector<8xf32>
    %7 = vector.shape_cast %6 : vector<8xf32> to vector<8x1xf32>
    %8 = vector.broadcast %7 : vector<8x1xf32> to vector<8x128xf32>
    %9 = arith.subf %5, %8 : vector<8x128xf32>
    %10 = math.exp %9 : vector<8x128xf32>
    %cst_6 = arith.constant dense<0.000000e+00> : vector<8xf32>
    %11 = vector.multi_reduction <add>, %10, %cst_6 [1] : vector<8x128xf32> to vector<8xf32>
    %12 = vector.shape_cast %11 : vector<8xf32> to vector<8x1xf32>
    %13 = math.log %12 : vector<8x1xf32>
    %14 = vector.broadcast %13 : vector<8x1xf32> to vector<8x128xf32>
    %15 = arith.subf %9, %14 : vector<8x128xf32>
    %c0_7 = arith.constant 0 : index
    %c0_8 = arith.constant 0 : index
    %16 = vector.load %arg4[%c0_7, %c0_8] : memref<8x128xf32, #tpu.memory_space<vmem>>, vector<8x128xf32>
    tpu.vector_store %arg4[%c0_7, %c0_8], %15 {strides = array<i32>} : memref<8x128xf32, #tpu.memory_space<vmem>>, vector<8x128xf32>,
    return
  }
  func.func @transform_0(%arg0: i32) -> (i32, i32) {
    %c0_i32 = arith.constant 0 : i32
    %c0_i32_0 = arith.constant 0 : i32
    return %arg0, %c0_i32 : i32, i32
  }
  func.func @transform_1(%arg0: i32) -> (i32, i32) {
    %c0_i32 = arith.constant 0 : i32
    %c0_i32_0 = arith.constant 0 : i32
    %c0_i32_1 = arith.constant 0 : i32
    return %c0_i32, %c0_i32_0 : i32, i32
  }
  func.func @transform_2(%arg0: i32) -> (i32, i32) {
    %c0_i32 = arith.constant 0 : i32
    %c0_i32_0 = arith.constant 0 : i32
    %c0_i32_1 = arith.constant 0 : i32
    return %c0_i32, %c0_i32_0 : i32, i32
  }
  func.func @transform_3(%arg0: i32) -> (i32, i32) {
    %c0_i32 = arith.constant 0 : i32
    %c0_i32_0 = arith.constant 0 : i32
    return %arg0, %c0_i32 : i32, i32
  }
}

</mosaic_0001>

<bundles_post_ra>
// kernel: tpu_custom_call.1
= control target key start
LH: loop header
LB: loop body
LE: loop exit
PB: predicated region body
PF: predicated region fallthrough
CT: control target
= control target key end

     0   :  { %8 = vsyncpa [#allocation3], 0  ;;  %s288_s0 = inlined_call_operand.hbm [shape: f32[8,32], index: 0, kind: input, shape index: {}]   ;;  %s289_s1 = inlined_call_operand.hbm [shape: f32[32,128], index: 1, kind: input, shape index: {}]   ;;  %s290_s2 = inlined_call_operand.vmem [shape: f32[1,128], index: 2, kind: input, shape index: {}]   ;;  %s291_s3 = inlined_call_operand.hbm [shape: f32[8,16], index: 3, kind: output, shape index: {}]  }
   0x1   :  { %9 = vsyncpa [#allocation6], 0 }
   0x2   :  { %10 = vsyncpa [#allocation4], 0  ;;  %s249_s12 = smov [#allocation2]   ;;  %s250_s14 = smov [#allocation5]  }
   0x3   :  { %s17_s13 = sshll.u32 %s249_s12, 4  ;;  %s26_s15 = sshll.u32 %s250_s14, 4  ;;  %s18_s13 = int_to_ptr.vmem [resolvable:$true] %s17_s13  ;;  %s27_s15 = int_to_ptr.vmem [resolvable:$true] %s26_s15 }
   0x4   :  { %s191_s16 = scalar_lea.vmem %s18_s13, 128  ;;  %p196_p1 = scmp.lt.s32.totalorder %s18_s13, %s18_s13 }
   0x5   :  { %p192_p0 = scmp.ne.s32.totalorder %s18_s13, %s191_s16  ;;  %p197_p2 = scmp.lt.s32.totalorder %s191_s16, %s191_s16 }
   0x7   :  { %p198_p3 = por %p197_p2, %p196_p1 }
   0x9   :  { %p199_p4 = pnand %p198_p3, %p192_p0 }
   0xb   :  { %202 = shalt.err (!%p199_p4)
}
   0xc   :  { %20 = dma.hbm_to_vmem [thread:$0]  %s288_s0, 128, %s18_s13, [#allocation3]  }
   0xd   :  { %s211_s19 = scalar_lea.vmem %s27_s15, 512  ;;  %p216_p6 = scmp.lt.s32.totalorder %s27_s15, %s27_s15 }
   0xe   :  { %p212_p5 = scmp.ne.s32.totalorder %s27_s15, %s211_s19  ;;  %p217_p7 = scmp.lt.s32.totalorder %s211_s19, %s211_s19 }
  0x10   :  { %p218_p8 = por %p217_p7, %p216_p6 }
  0x12   :  { %p219_p9 = pnand %p218_p8, %p212_p5 }
  0x14   :  { %222 = shalt.err (!%p219_p9)
}
  0x15   :  { %s251_s20 = smov 128   ;;  %s252_s21 = smov 8  }
  0x16   :  { %32 = dma.hbm_to_vmem [thread:$0]  %s289_s1, 512, %s27_s15, [#allocation6], %s251_s20, %s251_s20, %s252_s21  }
  0x17   :  { %243 = dma.done.wait [#allocation3], 128  }
  0x18   :  { %244 = vsyncadd [#allocation3], 4294967168 }
  0x19   :  { %245 = dma.done.wait [#allocation6], 512  }
  0x1a   :  { %246 = vsyncadd [#allocation6], 4294966784  ;;  %v253_v0 = vmov 0.0   ;;  %vm254_vm0 = vmmov 0   ;;  %v45_v1 = vld [vmem:[#allocation5 + $0x18] sm:$0xff]  ;;  %v44_v2 = vld [vmem:[#allocation5 + $0x10] sm:$0xff] }
  0x1b   :  { %161 = vmatprep.subr.mxu0 %v253_v0  ;;  %169 = vmatprep.mubr.msk.f32.mxu0 %vm254_vm0, %v253_v0  ;;  %v43_v3 = vld [vmem:[#allocation5 + $0x8] sm:$0xff]  ;;  %v42_v4 = vld [vmem:[#allocation5] sm:$0xff]  ;;  %v41_v5 = vld [vmem:[#allocation2] sm:$0xff]  ;;  %vm53_vm1 = vcmask 261120   ;;  %s255_s24 = smov [#allocation7]  }
  0x1c   :  { %162 = vmatpush3.msra.mxu0 %v45_v1  ;;  %v154_v6 = vld [vmem:[%s290_s2] ss:$0 sm:$0xff]  ;;  %s144_s25 = sshll.u32 %s255_s24, 4  ;;  %s145_s25 = int_to_ptr.vmem [resolvable:$true] %s144_s25 }
  0x1d   :  { %163 = vmatprep.subr.mxu0 %v253_v0  ;;  %s223_s2 = scalar_lea.vmem %s145_s25, 128  ;;  %p228_p11 = scmp.lt.s32.totalorder %s145_s25, %s145_s25 }
  0x1e   :  { %164 = vmatpush3.msra.mxu0 %v44_v2  ;;  %p224_p10 = scmp.ne.s32.totalorder %s145_s25, %s223_s2  ;;  %p229_p12 = scmp.lt.s32.totalorder %s223_s2, %s223_s2 }
  0x1f   :  { %165 = vmatprep.subr.mxu0 %v253_v0 }
  0x20   :  { %166 = vmatpush3.msra.mxu0 %v43_v3  ;;  %p230_p13 = por %p229_p12, %p228_p11 }
  0x21   :  { %167 = vmatprep.subr.mxu0 %v253_v0 }
  0x22   :  { %168 = vmatpush3.msra.mxu0 %v42_v4  ;;  %p231_p0 = pnand %p230_p13, %p224_p10 }
  0x23   :  { %170 = vmatmul.mubr.msk.f32.vlgmr.msra.gmra.mxu0 %vm53_vm1, %v41_v5 }
  0xe3   :  { %v123_v7 = vpop.f32.mrf.mxu0 }
  0xe4   :  { %v124_v8 = vadd.f32 %v154_v6, %v123_v7 }
  0xe5   :  { %v171_v9 = vpop.f32.mrf.mxu0 }
  0xe6   :  { %127 = vmax.xlane.f32.xlu0 %v124_v8 }
 0x16f   :  { %v128_v10 = vpop.xlane.xlu0 %127 }
 0x170   :  { %v129_v11 = vsub.f32 %v124_v8, %v128_v10 }
 0x172   :  { %v130_v12 = vmul.f32 1.442695, %v129_v11 }
 0x174   :  { %179 = vpow2.f32 %v130_v12 }
 0x181   :  { %v180_v13 = vpop.eup %179 }
 0x182   :  { %132 = vadd.xlane.f32.xlu0 %v180_v13 }
 0x20b   :  { %v133_v14 = vpop.xlane.xlu0 %132 }
 0x20c   :  { %181 = vlog2.f32 %v133_v14 }
 0x219   :  { %v182_v15 = vpop.eup %181 }
 0x21a   :  { %v135_v16 = vmul.f32 0.6931472, %v182_v15 }
 0x21c   :  { %v136_v17 = vsub.f32 %v129_v11, %v135_v16 }
 0x21e   :  { %137 = vst [vmem:[#allocation7] sm:$0xff] %v136_v17 }
 0x21f   :  { %234 = shalt.err (!%p231_p0)
}
 0x220   :  { %147 = dma.vmem_to_hbm [thread:$0]  %s145_s25, 128, %s291_s3, [#allocation4]  }
 0x221   :  { %247 = dma.done.wait [#allocation4], 128  }
 0x222   :  { %248 = vsyncadd [#allocation4], 4294967168 }
 0x223   :  { %151 = vsyncpa [#allocation3], 1 }
 0x224   :  { %152 = vsyncpa [#allocation6], 1 }
 0x225   :  { %153 = vsyncpa [#allocation4], 1 }

// kernel: tpu_custom_call.1
= control target key start
LH: loop header
LB: loop body
LE: loop exit
PB: predicated region body
PF: predicated region fallthrough
CT: control target
= control target key end

     0   :  { %8 = vsyncpa [#allocation3], 0  ;;  %s288_s0 = inlined_call_operand.hbm [shape: f32[8,32], index: 0, kind: input, shape index: {}]   ;;  %s289_s1 = inlined_call_operand.hbm [shape: f32[32,128], index: 1, kind: input, shape index: {}]   ;;  %s290_s2 = inlined_call_operand.vmem [shape: f32[1,128], index: 2, kind: input, shape index: {}]   ;;  %s291_s3 = inlined_call_operand.hbm [shape: f32[8,16], index: 3, kind: output, shape index: {}]  }
   0x1   :  { %9 = vsyncpa [#allocation6], 0 }
   0x2   :  { %10 = vsyncpa [#allocation4], 0  ;;  %s249_s12 = smov [#allocation2]   ;;  %s250_s14 = smov [#allocation5]  }
   0x3   :  { %s17_s13 = sshll.u32 %s249_s12, 4  ;;  %s26_s15 = sshll.u32 %s250_s14, 4  ;;  %s18_s13 = int_to_ptr.vmem [resolvable:$true] %s17_s13  ;;  %s27_s15 = int_to_ptr.vmem [resolvable:$true] %s26_s15 }
   0x4   :  { %s191_s16 = scalar_lea.vmem %s18_s13, 128  ;;  %p196_p1 = scmp.lt.s32.totalorder %s18_s13, %s18_s13 }
   0x5   :  { %p192_p0 = scmp.ne.s32.totalorder %s18_s13, %s191_s16  ;;  %p197_p2 = scmp.lt.s32.totalorder %s191_s16, %s191_s16 }
   0x7   :  { %p198_p3 = por %p197_p2, %p196_p1 }
   0x9   :  { %p199_p4 = pnand %p198_p3, %p192_p0 }
   0xb   :  { %202 = shalt.err (!%p199_p4)
}
   0xc   :  { %20 = dma.hbm_to_vmem [thread:$0]  %s288_s0, 128, %s18_s13, [#allocation3]  }
   0xd   :  { %s211_s19 = scalar_lea.vmem %s27_s15, 512  ;;  %p216_p6 = scmp.lt.s32.totalorder %s27_s15, %s27_s15 }
   0xe   :  { %p212_p5 = scmp.ne.s32.totalorder %s27_s15, %s211_s19  ;;  %p217_p7 = scmp.lt.s32.totalorder %s211_s19, %s211_s19 }
  0x10   :  { %p218_p8 = por %p217_p7, %p216_p6 }
  0x12   :  { %p219_p9 = pnand %p218_p8, %p212_p5 }
  0x14   :  { %222 = shalt.err (!%p219_p9)
}
  0x15   :  { %s251_s20 = smov 128   ;;  %s252_s21 = smov 8  }
  0x16   :  { %32 = dma.hbm_to_vmem [thread:$0]  %s289_s1, 512, %s27_s15, [#allocation6], %s251_s20, %s251_s20, %s252_s21  }
  0x17   :  { %243 = dma.done.wait [#allocation3], 128  }
  0x18   :  { %244 = vsyncadd [#allocation3], 4294967168 }
  0x19   :  { %245 = dma.done.wait [#allocation6], 512  }
  0x1a   :  { %246 = vsyncadd [#allocation6], 4294966784  ;;  %v253_v0 = vmov 0.0   ;;  %vm254_vm0 = vmmov 0   ;;  %v45_v1 = vld [vmem:[#allocation5 + $0x18] sm:$0xff]  ;;  %v44_v2 = vld [vmem:[#allocation5 + $0x10] sm:$0xff] }
  0x1b   :  { %161 = vmatprep.subr.mxu0 %v253_v0  ;;  %169 = vmatprep.mubr.msk.f32.mxu0 %vm254_vm0, %v253_v0  ;;  %v43_v3 = vld [vmem:[#allocation5 + $0x8] sm:$0xff]  ;;  %v42_v4 = vld [vmem:[#allocation5] sm:$0xff]  ;;  %v41_v5 = vld [vmem:[#allocation2] sm:$0xff]  ;;  %vm53_vm1 = vcmask 261120   ;;  %s255_s24 = smov [#allocation7]  }
  0x1c   :  { %162 = vmatpush3.msra.mxu0 %v45_v1  ;;  %v154_v6 = vld [vmem:[%s290_s2] ss:$0 sm:$0xff]  ;;  %s144_s25 = sshll.u32 %s255_s24, 4  ;;  %s145_s25 = int_to_ptr.vmem [resolvable:$true] %s144_s25 }
  0x1d   :  { %163 = vmatprep.subr.mxu0 %v253_v0  ;;  %s223_s2 = scalar_lea.vmem %s145_s25, 128  ;;  %p228_p11 = scmp.lt.s32.totalorder %s145_s25, %s145_s25 }
  0x1e   :  { %164 = vmatpush3.msra.mxu0 %v44_v2  ;;  %p224_p10 = scmp.ne.s32.totalorder %s145_s25, %s223_s2  ;;  %p229_p12 = scmp.lt.s32.totalorder %s223_s2, %s223_s2 }
  0x1f   :  { %165 = vmatprep.subr.mxu0 %v253_v0 }
  0x20   :  { %166 = vmatpush3.msra.mxu0 %v43_v3  ;;  %p230_p13 = por %p229_p12, %p228_p11 }
  0x21   :  { %167 = vmatprep.subr.mxu0 %v253_v0 }
  0x22   :  { %168 = vmatpush3.msra.mxu0 %v42_v4  ;;  %p231_p0 = pnand %p230_p13, %p224_p10 }
  0x23   :  { %170 = vmatmul.mubr.msk.f32.vlgmr.msra.gmra.mxu0 %vm53_vm1, %v41_v5 }
  0xe3   :  { %v123_v7 = vpop.f32.mrf.mxu0 }
  0xe4   :  { %v124_v8 = vadd.f32 %v154_v6, %v123_v7 }
  0xe5   :  { %v171_v9 = vpop.f32.mrf.mxu0 }
  0xe6   :  { %127 = vmax.xlane.f32.xlu0 %v124_v8 }
 0x16f   :  { %v128_v10 = vpop.xlane.xlu0 %127 }
 0x170   :  { %v129_v11 = vsub.f32 %v124_v8, %v128_v10 }
 0x172   :  { %v130_v12 = vmul.f32 1.442695, %v129_v11 }
 0x174   :  { %179 = vpow2.f32 %v130_v12 }
 0x181   :  { %v180_v13 = vpop.eup %179 }
 0x182   :  { %132 = vadd.xlane.f32.xlu0 %v180_v13 }
 0x20b   :  { %v133_v14 = vpop.xlane.xlu0 %132 }
 0x20c   :  { %181 = vlog2.f32 %v133_v14 }
 0x219   :  { %v182_v15 = vpop.eup %181 }
 0x21a   :  { %v135_v16 = vmul.f32 0.6931472, %v182_v15 }
 0x21c   :  { %v136_v17 = vsub.f32 %v129_v11, %v135_v16 }
 0x21e   :  { %137 = vst [vmem:[#allocation7] sm:$0xff] %v136_v17 }
 0x21f   :  { %234 = shalt.err (!%p231_p0)
}
 0x220   :  { %147 = dma.vmem_to_hbm [thread:$0]  %s145_s25, 128, %s291_s3, [#allocation4]  }
 0x221   :  { %247 = dma.done.wait [#allocation4], 128  }
 0x222   :  { %248 = vsyncadd [#allocation4], 4294967168 }
 0x223   :  { %151 = vsyncpa [#allocation3], 1 }
 0x224   :  { %152 = vsyncpa [#allocation6], 1 }
 0x225   :  { %153 = vsyncpa [#allocation4], 1 }

</bundles_post_ra>
